<compile_context>
chip_gen: v6e
topology: v6e:2x2x1
jax: 0.10.0
libtpu: 0.0.40
codegen_flags: <defaults>
</compile_context>

<pallas_src>
from functools import partial

import jax
import jax.numpy as jnp
from jax.experimental import pallas as pl
from jax.experimental.pallas import tpu as pltpu


def _round_up(x, m):
    return (x + m - 1) // m * m


# ---------------------------------------------------------------------------
# Fused decoder kernel: one row-tile of time series per grid step.
# ---------------------------------------------------------------------------
def _decoder_fused_kernel(xf_ref, ht_ref,
                          wg_x_ref, wg_h_ref, bg_ref,
                          wl_x_ref, wl_gc_ref, bl_ref,
                          o_ref, *, relu_cols):
    # Global MLP (cat([xf, ht_expanded]) folded into the weight split):
    #   g = xf_flat @ Wg_xf + ht @ (sum_h Wg_ht_h) + bg   -> (TN, (H+1)*D) f32
    g = (jnp.dot(xf_ref[...], wg_x_ref[...], preferred_element_type=jnp.float32)
         + jnp.dot(ht_ref[...], wg_h_ref[...], preferred_element_type=jnp.float32)
         + bg_ref[...])

    # Full-width masked ReLU: first H*D columns (C) clamp at 0, last D columns
    # (ca) stay linear.  Avoids sub-vreg slices of g and lets C and ca be
    # consumed by ONE matmul against the stacked [Wl_C_blockdiag ; Wl_ca] weight.
    col = jax.lax.broadcasted_iota(jnp.int32, g.shape, dimension=1)
    h = jnp.where(col < relu_cols, jnp.maximum(g, 0.0), g).astype(wl_gc_ref.dtype)

    # Local MLP for ALL horizons in one shot (block-diagonal weights, f32 accum).
    o_ref[...] = (
        jnp.dot(xf_ref[...], wl_x_ref[...], preferred_element_type=jnp.float32)
        + jnp.dot(h, wl_gc_ref[...], preferred_element_type=jnp.float32)
        + bl_ref[...])


# ---------------------------------------------------------------------------
# One-time weight preparation (transpose / split / block-diag / stack / pad / cast).
# ---------------------------------------------------------------------------
def prepare_decoder_params(params, input_size, output_horizon,
                           encoder_hidden_size, decoder_hidden_size,
                           compute_dtype=jnp.bfloat16):
    H, I, E, D = output_horizon, input_size, encoder_hidden_size, decoder_hidden_size
    wg, bg = params["global_w"], params["global_b"]   # (Mg, Kg), (Mg,)
    wl, bl = params["local_w"], params["local_b"]     # (O, Kl), (O,)
    O = bl.shape[0]
    Mg = (H + 1) * D

    # Global weight split: rows of wg.T are ordered per horizon as [xf_h | ht].
    wg_t = wg.T.reshape(H, I + E, Mg)
    wg_x = wg_t[:, :I, :].reshape(H * I, Mg)          # matches xf.reshape(N, H*I)
    wg_h = wg_t[:, I:, :].sum(axis=0)                 # (E, Mg): folds the ht broadcast

    # Local weight split: rows of wl.T are ordered [xf_i | C_i | ca].
    wl_t = wl.T                                       # (Kl, O)
    wl_x, wl_c, wl_ca = wl_t[:I], wl_t[I:I + D], wl_t[I + D:]

    o_pad = _round_up(H * O, 128)                     # lane-dense output slab
    eye = jnp.eye(H, dtype=wl.dtype)
    # TODO(synk): for large output_horizon (H >= ~24) this block-diagonal weight
    # gets too sparse; switch to a per-horizon grouped matmul at that point.
    wl_x_bd = jnp.kron(eye, wl_x)                     # (H*I, H*O) block-diagonal
    wl_c_bd = jnp.kron(eye, wl_c)                     # (H*D, H*O) block-diagonal
    wl_ca_rep = jnp.tile(wl_ca, (1, H))               # (D,   H*O) ca reused per horizon
    wl_gc = jnp.concatenate([wl_c_bd, wl_ca_rep], 0)  # (Mg,  H*O) — same row order as g
    bl_rep = jnp.tile(bl, H).reshape(1, H * O)        # (1, H*O)

    def pad_cols(a):
        return jnp.pad(a, ((0, 0), (0, o_pad - H * O)))

    return {
        "wg_x": wg_x.astype(compute_dtype),
        "wg_h": wg_h.astype(compute_dtype),
        "bg": bg.reshape(1, Mg).astype(jnp.float32),
        "wl_x": pad_cols(wl_x_bd).astype(compute_dtype),
        "wl_gc": pad_cols(wl_gc).astype(compute_dtype),
        "bl": pad_cols(bl_rep).astype(jnp.float32),
    }


# ---------------------------------------------------------------------------
# Row-tile selection: pad N to a sublane multiple first, then derive the tile
# from a step count so residual padding is < one tile and (when there are
# enough rows) the grid has >= min_grid_steps steps for v7x's two TensorCores.
# ---------------------------------------------------------------------------
def _choose_row_tile(n, row_tile, min_grid_steps):
    n8 = _round_up(max(n, 1), 8)
    steps = max(min_grid_steps, pl.cdiv(n8, row_tile))
    tn = _round_up(pl.cdiv(n8, steps), 8)
    n_pad = _round_up(n8, tn)
    return tn, n_pad


# ---------------------------------------------------------------------------
# Forward wrapper.
# ---------------------------------------------------------------------------
def decoder_forward(ht, xf, prep, decoder_hidden_size, output_size,
                    row_tile=2048, min_grid_steps=2):
    """Pallas implementation of Decoder.forward (prep from prepare_decoder_params)."""
    N, H, I = xf.shape
    _, E = ht.shape
    D = decoder_hidden_size
    O = output_size
    Mg = (H + 1) * D
    o_pad = prep["bl"].shape[1]
    cdt = prep["wg_x"].dtype                          # bf16 compute dtype

    xf_flat = xf.reshape(N, H * I).astype(cdt)
    ht_c = ht.astype(cdt)

    tn, n_pad = _choose_row_tile(N, row_tile, min_grid_steps)
    if n_pad != N:
        xf_flat = jnp.pad(xf_flat, ((0, n_pad - N), (0, 0)))
        ht_c = jnp.pad(ht_c, ((0, n_pad - N), (0, 0)))

    grid = (n_pad // tn,)

    in_bytes = jnp.dtype(cdt).itemsize
    flops = 2 * n_pad * (H * I * Mg + E * Mg + (H * I + Mg) * o_pad)
    bytes_accessed = (
        in_bytes * (n_pad * (H * I + E)
                    + prep["wg_x"].size + prep["wg_h"].size
                    + prep["wl_x"].size + prep["wl_gc"].size)
        + 4 * (n_pad * o_pad + prep["bg"].size + prep["bl"].size))

    rowwise = lambda i: (i, 0)     # per-tile input/output blocks
    resident = lambda i: (0, 0)    # weights/biases stay resident across the grid
    # TODO(synk): the resident weight/bias specs could use
    # pipeline_mode=pl.Buffered(1) for a little extra VMEM headroom; footprint
    # is negligible at these shapes so it is left at the default.

    y_pad = pl.pallas_call(
        partial(_decoder_fused_kernel, relu_cols=H * D),
        out_shape=jax.ShapeDtypeStruct((n_pad, o_pad), jnp.float32),
        grid=grid,
        in_specs=[
            pl.BlockSpec((tn, H * I), rowwise),
            pl.BlockSpec((tn, E), rowwise),
            pl.BlockSpec((H * I, Mg), resident),
            pl.BlockSpec((E, Mg), resident),
            pl.BlockSpec((1, Mg), resident),
            pl.BlockSpec((H * I, o_pad), resident),
            pl.BlockSpec((Mg, o_pad), resident),
            pl.BlockSpec((1, o_pad), resident),
        ],
        out_specs=pl.BlockSpec((tn, o_pad), rowwise),
        compiler_params=pltpu.CompilerParams(
            dimension_semantics=("parallel",)),
        cost_estimate=pl.CostEstimate(
            flops=flops, transcendentals=0, bytes_accessed=bytes_accessed),
    )(xf_flat, ht_c,
      prep["wg_x"], prep["wg_h"], prep["bg"],
      prep["wl_x"], prep["wl_gc"], prep["bl"])

    # Output is a 128-lane-dense f32 slab; the slice/reshape below is layout
    # plumbing only.  TODO(synk): let downstream consume the padded slab
    # directly (and/or emit bf16 output) to cut the extra HBM pass on v5e.
    return y_pad[:N, :H * O].reshape(N, H, O)


# ---------------------------------------------------------------------------
# Pure-JAX reference mirroring the PyTorch forward exactly (f32).
# ---------------------------------------------------------------------------
def decoder_forward_ref(ht, xf, params, decoder_hidden_size):
    num_ts, output_horizon, num_features = xf.shape
    _, hidden_size = ht.shape
    D = decoder_hidden_size
    wg, bg = params["global_w"], params["global_b"]
    wl, bl = params["local_w"], params["local_b"]

    ht_exp = jnp.broadcast_to(ht[:, None, :], (num_ts, output_horizon, hidden_size))
    inp = jnp.concatenate([xf, ht_exp], axis=2).reshape(num_ts, -1)
    contexts = inp @ wg.T + bg
    contexts = contexts.reshape(num_ts, output_horizon + 1, D)
    ca = contexts[:, -1, :]
    C = jax.nn.relu(contexts[:, :-1, :])
    ys = []
    for i in range(output_horizon):
        li = jnp.concatenate([xf[:, i, :], C[:, i, :], ca], axis=1)
        ys.append((li @ wl.T + bl)[:, None, :])
    return jnp.concatenate(ys, axis=1)


def init_params(key, input_size, output_horizon, encoder_hidden_size,
                decoder_hidden_size, output_size):
    """Deterministic PyTorch-Linear-style init (U(-1/sqrt(in), 1/sqrt(in)))."""
    kg_in = output_horizon * (encoder_hidden_size + input_size)
    kg_out = (output_horizon + 1) * decoder_hidden_size
    kl_in = decoder_hidden_size * 2 + input_size
    kl_out = output_size

    k1, k2, k3, k4 = jax.random.split(key, 4)
    bg_bound = 1.0 / jnp.sqrt(jnp.float32(kg_in))
    bl_bound = 1.0 / jnp.sqrt(jnp.float32(kl_in))
    return {
        "global_w": jax.random.uniform(k1, (kg_out, kg_in), jnp.float32,
                                       -bg_bound, bg_bound),
        "global_b": jax.random.uniform(k2, (kg_out,), jnp.float32,
                                       -bg_bound, bg_bound),
        "local_w": jax.random.uniform(k3, (kl_out, kl_in), jnp.float32,
                                      -bl_bound, bl_bound),
        "local_b": jax.random.uniform(k4, (kl_out,), jnp.float32,
                                      -bl_bound, bl_bound),
    }


if __name__ == "__main__":
    # Small, module-consistent shapes.
    num_ts = 2            # batch of time series
    output_horizon = 8
    input_size = 4        # num_features of xf
    encoder_hidden_size = 16
    decoder_hidden_size = 32
    output_size = 3       # e.g. number of quantiles

    key = jax.random.PRNGKey(0)
    kp, kh, kx = jax.random.split(key, 3)

    params = init_params(kp, input_size, output_horizon, encoder_hidden_size,
                         decoder_hidden_size, output_size)
    ht = jax.random.normal(kh, (num_ts, encoder_hidden_size), jnp.float32)
    xf = jax.random.normal(kx, (num_ts, output_horizon, input_size), jnp.float32)

    # One-time weight prep (outside the hot path; bf16 matmul operands).
    prep = prepare_decoder_params(params, input_size, output_horizon,
                                  encoder_hidden_size, decoder_hidden_size)

    y = decoder_forward(ht, xf, prep, decoder_hidden_size, output_size)
    y = jax.block_until_ready(y)

    y_ref = decoder_forward_ref(ht, xf, params, decoder_hidden_size)
    assert y.shape == (num_ts, output_horizon, output_size), y.shape
    # Tolerance relaxed vs the f32 reference because matmul operands are bf16
    # (accumulation and biases stay f32).
    assert jnp.allclose(y, y_ref, atol=3e-2, rtol=3e-2), \
        float(jnp.max(jnp.abs(y - y_ref)))

    print("KERNEL_OK")
</pallas_src>

<mosaic_0001>
module attributes {stable_mosaic.version = 11 : i64} {
  func.func @_decoder_fused_kernel(%arg0: i32, %arg1: memref<8x32xbf16, #tpu.memory_space<vmem>>, %arg2: memref<8x16xbf16, #tpu.memory_space<vmem>>, %arg3: memref<32x288xbf16, #tpu.memory_space<vmem>>, %arg4: memref<16x288xbf16, #tpu.memory_space<vmem>>, %arg5: memref<1x288xf32, #tpu.memory_space<vmem>>, %arg6: memref<32x128xbf16, #tpu.memory_space<vmem>>, %arg7: memref<288x128xbf16, #tpu.memory_space<vmem>>, %arg8: memref<1x128xf32, #tpu.memory_space<vmem>>, %arg9: memref<8x128xf32, #tpu.memory_space<vmem>>) attributes {dimension_semantics = [#tpu.dimension_semantics<parallel>], iteration_bounds = array<i64: 1>, scalar_prefetch = 0 : i64, scratch_operands = 0 : i64, tpu.core_type = #tpu.core_type<tc>, window_params = [{transform_indices = @transform_0, window_bounds = array<i64: 8, 32>}, {transform_indices = @transform_1, window_bounds = array<i64: 8, 16>}, {pipeline_mode = #tpu.pipeline_mode<synchronous>, transform_indices = @transform_2, window_bounds = array<i64: 32, 288>}, {pipeline_mode = #tpu.pipeline_mode<synchronous>, transform_indices = @transform_3, window_bounds = array<i64: 16, 288>}, {pipeline_mode = #tpu.pipeline_mode<synchronous>, transform_indices = @transform_4, window_bounds = array<i64: 1, 288>}, {pipeline_mode = #tpu.pipeline_mode<synchronous>, transform_indices = @transform_5, window_bounds = array<i64: 32, 128>}, {pipeline_mode = #tpu.pipeline_mode<synchronous>, transform_indices = @transform_6, window_bounds = array<i64: 288, 128>}, {pipeline_mode = #tpu.pipeline_mode<synchronous>, transform_indices = @transform_7, window_bounds = array<i64: 1, 128>}, {transform_indices = @transform_8, window_bounds = array<i64: 8, 128>}]} {
    %c0 = arith.constant 0 : index
    %c0_0 = arith.constant 0 : index
    %0 = vector.load %arg1[%c0, %c0_0] : memref<8x32xbf16, #tpu.memory_space<vmem>>, vector<8x32xbf16>
    %c0_1 = arith.constant 0 : index
    %c0_2 = arith.constant 0 : index
    %1 = vector.load %arg3[%c0_1, %c0_2] : memref<32x288xbf16, #tpu.memory_space<vmem>>, vector<32x288xbf16>
    %cst = arith.constant dense<0.000000e+00> : vector<8x288xf32>
    %2 = tpu.matmul %0, %1, %cst {dimension_numbers = #tpu.dot_dimension_numbers<[1], [0], [0], [1], [0, 0, 1, 1], [], []>} : vector<8x32xbf16>, vector<32x288xbf16>, vector<8x288xf32> -> vector<8x288xf32>
    %c0_3 = arith.constant 0 : index
    %c0_4 = arith.constant 0 : index
    %3 = vector.load %arg2[%c0_3, %c0_4] : memref<8x16xbf16, #tpu.memory_space<vmem>>, vector<8x16xbf16>
    %c0_5 = arith.constant 0 : index
    %c0_6 = arith.constant 0 : index
    %4 = vector.load %arg4[%c0_5, %c0_6] : memref<16x288xbf16, #tpu.memory_space<vmem>>, vector<16x288xbf16>
    %cst_7 = arith.constant dense<0.000000e+00> : vector<8x288xf32>
    %5 = tpu.matmul %3, %4, %cst_7 {dimension_numbers = #tpu.dot_dimension_numbers<[1], [0], [0], [1], [0, 0, 1, 1], [], []>} : vector<8x16xbf16>, vector<16x288xbf16>, vector<8x288xf32> -> vector<8x288xf32>
    %6 = arith.addf %2, %5 : vector<8x288xf32>
    %c0_8 = arith.constant 0 : index
    %c0_9 = arith.constant 0 : index
    %7 = vector.load %arg5[%c0_8, %c0_9] : memref<1x288xf32, #tpu.memory_space<vmem>>, vector<1x288xf32>
    %8 = vector.broadcast %7 : vector<1x288xf32> to vector<8x288xf32>
    %9 = arith.addf %6, %8 : vector<8x288xf32>
    %10 = tpu.iota {dimensions = array<i32: 1>} : vector<8x288xi32>
    %c256_i32 = arith.constant 256 : i32
    %11 = vector.broadcast %c256_i32 : i32 to vector<8x288xi32>
    %12 = arith.cmpi slt, %10, %11 : vector<8x288xi32>
    %cst_10 = arith.constant 0.000000e+00 : f32
    %13 = vector.broadcast %cst_10 : f32 to vector<8x288xf32>
    %14 = arith.maximumf %9, %13 : vector<8x288xf32>
    %15 = arith.select %12, %14, %9 : vector<8x288xi1>, vector<8x288xf32>
    %16 = arith.truncf %15 : vector<8x288xf32> to vector<8x288xbf16>
    %c0_11 = arith.constant 0 : index
    %c0_12 = arith.constant 0 : index
    %17 = vector.load %arg1[%c0_11, %c0_12] : memref<8x32xbf16, #tpu.memory_space<vmem>>, vector<8x32xbf16>
    %c0_13 = arith.constant 0 : index
    %c0_14 = arith.constant 0 : index
    %18 = vector.load %arg6[%c0_13, %c0_14] : memref<32x128xbf16, #tpu.memory_space<vmem>>, vector<32x128xbf16>
    %cst_15 = arith.constant dense<0.000000e+00> : vector<8x128xf32>
    %19 = tpu.matmul %17, %18, %cst_15 {dimension_numbers = #tpu.dot_dimension_numbers<[1], [0], [0], [1], [0, 0, 1, 1], [], []>} : vector<8x32xbf16>, vector<32x128xbf16>, vector<8x128xf32> -> vector<8x128xf32>
    %c0_16 = arith.constant 0 : index
    %c0_17 = arith.constant 0 : index
    %20 = vector.load %arg7[%c0_16, %c0_17] : memref<288x128xbf16, #tpu.memory_space<vmem>>, vector<288x128xbf16>
    %cst_18 = arith.constant dense<0.000000e+00> : vector<8x128xf32>
    %21 = tpu.matmul %16, %20, %cst_18 {dimension_numbers = #tpu.dot_dimension_numbers<[1], [0], [0], [1], [0, 0, 1, 1], [], []>} : vector<8x288xbf16>, vector<288x128xbf16>, vector<8x128xf32> -> vector<8x128xf32>
    %22 = arith.addf %19, %21 : vector<8x128xf32>
    %c0_19 = arith.constant 0 : index
    %c0_20 = arith.constant 0 : index
    %23 = vector.load %arg8[%c0_19, %c0_20] : memref<1x128xf32, #tpu.memory_space<vmem>>, vector<1x128xf32>
    %24 = vector.broadcast %23 : vector<1x128xf32> to vector<8x128xf32>
    %25 = arith.addf %22, %24 : vector<8x128xf32>
    %c0_21 = arith.constant 0 : index
    %c0_22 = arith.constant 0 : index
    %26 = vector.load %arg9[%c0_21, %c0_22] : memref<8x128xf32, #tpu.memory_space<vmem>>, vector<8x128xf32>
    tpu.vector_store %arg9[%c0_21, %c0_22], %25 {strides = array<i32>} : memref<8x128xf32, #tpu.memory_space<vmem>>, vector<8x128xf32>,
    return
  }
  func.func @transform_0(%arg0: i32) -> (i32, i32) {
    %c0_i32 = arith.constant 0 : i32
    %c0_i32_0 = arith.constant 0 : i32
    return %arg0, %c0_i32 : i32, i32
  }
  func.func @transform_1(%arg0: i32) -> (i32, i32) {
    %c0_i32 = arith.constant 0 : i32
    %c0_i32_0 = arith.constant 0 : i32
    return %arg0, %c0_i32 : i32, i32
  }
  func.func @transform_2(%arg0: i32) -> (i32, i32) {
    %c0_i32 = arith.constant 0 : i32
    %c0_i32_0 = arith.constant 0 : i32
    %c0_i32_1 = arith.constant 0 : i32
    return %c0_i32, %c0_i32_0 : i32, i32
  }
  func.func @transform_3(%arg0: i32) -> (i32, i32) {
    %c0_i32 = arith.constant 0 : i32
    %c0_i32_0 = arith.constant 0 : i32
    %c0_i32_1 = arith.constant 0 : i32
    return %c0_i32, %c0_i32_0 : i32, i32
  }
  func.func @transform_4(%arg0: i32) -> (i32, i32) {
    %c0_i32 = arith.constant 0 : i32
    %c0_i32_0 = arith.constant 0 : i32
    %c0_i32_1 = arith.constant 0 : i32
    return %c0_i32, %c0_i32_0 : i32, i32
  }
  func.func @transform_5(%arg0: i32) -> (i32, i32) {
    %c0_i32 = arith.constant 0 : i32
    %c0_i32_0 = arith.constant 0 : i32
    %c0_i32_1 = arith.constant 0 : i32
    return %c0_i32, %c0_i32_0 : i32, i32
  }
  func.func @transform_6(%arg0: i32) -> (i32, i32) {
    %c0_i32 = arith.constant 0 : i32
    %c0_i32_0 = arith.constant 0 : i32
    %c0_i32_1 = arith.constant 0 : i32
    return %c0_i32, %c0_i32_0 : i32, i32
  }
  func.func @transform_7(%arg0: i32) -> (i32, i32) {
    %c0_i32 = arith.constant 0 : i32
    %c0_i32_0 = arith.constant 0 : i32
    %c0_i32_1 = arith.constant 0 : i32
    return %c0_i32, %c0_i32_0 : i32, i32
  }
  func.func @transform_8(%arg0: i32) -> (i32, i32) {
    %c0_i32 = arith.constant 0 : i32
    %c0_i32_0 = arith.constant 0 : i32
    return %arg0, %c0_i32 : i32, i32
  }
}

</mosaic_0001>

<bundles_post_ra>
// kernel: tpu_custom_call.1
= control target key start
LH: loop header
LB: loop body
LE: loop exit
PB: predicated region body
PF: predicated region fallthrough
CT: control target
= control target key end

     0   :  { %13 = vsyncpa [#allocation3], 0  ;;  %s1094_s0 = inlined_call_operand.hbm [shape: bf16[8,32], index: 0, kind: input, shape index: {}]   ;;  %s1095_s1 = inlined_call_operand.hbm [shape: bf16[8,16], index: 1, kind: input, shape index: {}]   ;;  %s1096_s2 = inlined_call_operand.hbm [shape: bf16[32,288], index: 2, kind: input, shape index: {}]   ;;  %s1097_s3 = inlined_call_operand.hbm [shape: bf16[16,288], index: 3, kind: input, shape index: {}]   ;;  %s1098_s4 = inlined_call_operand.vmem [shape: f32[1,288], index: 4, kind: input, shape index: {}]   ;;  %s1099_s5 = inlined_call_operand.hbm [shape: bf16[32,128], index: 5, kind: input, shape index: {}]   ;;  %s1100_s6 = inlined_call_operand.hbm [shape: bf16[288,128], index: 6, kind: input, shape index: {}]   ;;  %s1101_s7 = inlined_call_operand.vmem [shape: f32[1,128], index: 7, kind: input, shape index: {}]   ;;  %s1102_s8 = inlined_call_operand.hbm [shape: f32[8,128], index: 8, kind: output, shape index: {}]  }
   0x1   :  { %14 = vsyncpa [#allocation6], 0 }
   0x2   :  { %15 = vsyncpa [#allocation9], 0 }
   0x3   :  { %16 = vsyncpa [#allocation12], 0 }
   0x4   :  { %17 = vsyncpa [#allocation4], 0  ;;  %s982_s27 = smov [#allocation5]  }
   0x5   :  { %s34_s28 = sshll.u32 %s982_s27, 4  ;;  %s35_s28 = int_to_ptr.vmem [resolvable:$true] %s34_s28 }
   0x6   :  { %s840_s29 = scalar_lea.vmem %s35_s28, 64  ;;  %p845_p1 = scmp.lt.s32.totalorder %s35_s28, %s35_s28 }
   0x7   :  { %p841_p0 = scmp.ne.s32.totalorder %s35_s28, %s840_s29  ;;  %p846_p2 = scmp.lt.s32.totalorder %s840_s29, %s840_s29 }
   0x9   :  { %p847_p3 = por %p846_p2, %p845_p1 }
   0xb   :  { %p848_p4 = pnand %p847_p3, %p841_p0 }
   0xd   :  { %851 = shalt.err (!%p848_p4)
}
   0xe   :  { %37 = dma.hbm_to_vmem [thread:$0]  %s1095_s1, 64, %s35_s28, [#allocation6]  }
   0xf   :  { %s983_s10 = smov [#allocation8]   ;;  %s984_s12 = smov [#allocation2]  }
  0x10   :  { %s55_s11 = sshll.u32 %s983_s10, 4  ;;  %s24_s13 = sshll.u32 %s984_s12, 4  ;;  %s56_s11 = int_to_ptr.vmem [resolvable:$true] %s55_s11  ;;  %s25_s13 = int_to_ptr.vmem [resolvable:$true] %s24_s13 }
  0x11   :  { %s860_s14 = scalar_lea.vmem %s56_s11, 384  ;;  %p865_p6 = scmp.lt.s32.totalorder %s56_s11, %s56_s11 }
  0x12   :  { %p861_p5 = scmp.ne.s32.totalorder %s56_s11, %s860_s14  ;;  %p866_p7 = scmp.lt.s32.totalorder %s860_s14, %s860_s14 }
  0x14   :  { %p867_p8 = por %p866_p7, %p865_p6 }
  0x16   :  { %p868_p9 = pnand %p867_p8, %p861_p5 }
  0x18   :  { %871 = shalt.err (!%p868_p9)
}
  0x19   :  { %s985_s15 = smov 192   ;;  %s986_s16 = smov 12  }
  0x1a   :  { %61 = dma.hbm_to_vmem [thread:$0]  %s1097_s3, 384, %s56_s11, [#allocation9], %s985_s15, %s985_s15, %s986_s16  }
  0x1b   :  { %s880_s1 = scalar_lea.vmem %s25_s13, 64  ;;  %p885_p11 = scmp.lt.s32.totalorder %s25_s13, %s25_s13 }
  0x1c   :  { %p881_p10 = scmp.ne.s32.totalorder %s25_s13, %s880_s1  ;;  %p886_p12 = scmp.lt.s32.totalorder %s880_s1, %s880_s1 }
  0x1e   :  { %p887_p13 = por %p886_p12, %p885_p11 }
  0x20   :  { %p888_p0 = pnand %p887_p13, %p881_p10 }
  0x22   :  { %891 = shalt.err (!%p888_p0)
}
  0x23   :  { %27 = dma.hbm_to_vmem [thread:$0]  %s1094_s0, 64, %s25_s13, [#allocation3]  }
  0x24   :  { %s987_s21 = smov [#allocation7]   ;;  %s988_s23 = smov [#allocation10]  }
  0x25   :  { %s43_s22 = sshll.u32 %s987_s21, 4  ;;  %s69_s24 = sshll.u32 %s988_s23, 4  ;;  %s44_s22 = int_to_ptr.vmem [resolvable:$true] %s43_s22  ;;  %s70_s24 = int_to_ptr.vmem [resolvable:$true] %s69_s24 }
  0x26   :  { %s900_s25 = scalar_lea.vmem %s44_s22, 768  ;;  %p905_p2 = scmp.lt.s32.totalorder %s44_s22, %s44_s22 }
  0x27   :  { %p901_p1 = scmp.ne.s32.totalorder %s44_s22, %s900_s25  ;;  %p906_p3 = scmp.lt.s32.totalorder %s900_s25, %s900_s25 }
  0x29   :  { %p907_p4 = por %p906_p3, %p905_p2 }
  0x2b   :  { %p908_p5 = pnand %p907_p4, %p901_p1 }
  0x2d   :  { %911 = shalt.err (!%p908_p5)
}
  0x2e   :  { %49 = dma.hbm_to_vmem [thread:$0]  %s1096_s2, 768, %s44_s22, [#allocation6], %s985_s15, %s985_s15, %s986_s16  }
  0x2f   :  { %s920_s27 = scalar_lea.vmem %s70_s24, 256  ;;  %p925_p7 = scmp.lt.s32.totalorder %s70_s24, %s70_s24 }
  0x30   :  { %p921_p6 = scmp.ne.s32.totalorder %s70_s24, %s920_s27  ;;  %p926_p8 = scmp.lt.s32.totalorder %s920_s27, %s920_s27 }
  0x32   :  { %p927_p9 = por %p926_p8, %p925_p7 }
  0x34   :  { %p928_p10 = pnand %p927_p9, %p921_p6 }
  0x36   :  { %931 = shalt.err (!%p928_p10)
}
  0x37   :  { %s989_s0 = smov 64   ;;  %s990_s28 = smov 4  }
  0x38   :  { %75 = dma.hbm_to_vmem [thread:$0]  %s1099_s5, 256, %s70_s24, [#allocation9], %s989_s0, %s989_s0, %s990_s28  }
  0x39   :  { %s991_s9 = smov [#allocation11]  }
  0x3a   :  { %s81_s10 = sshll.u32 %s991_s9, 4  ;;  %s82_s10 = int_to_ptr.vmem [resolvable:$true] %s81_s10 }
  0x3b   :  { %s940_s11 = scalar_lea.vmem %s82_s10, 2304  ;;  %p945_p12 = scmp.lt.s32.totalorder %s82_s10, %s82_s10 }
  0x3c   :  { %p941_p11 = scmp.ne.s32.totalorder %s82_s10, %s940_s11  ;;  %p946_p13 = scmp.lt.s32.totalorder %s940_s11, %s940_s11 }
  0x3e   :  { %p947_p0 = por %p946_p13, %p945_p12 }
  0x40   :  { %p948_p1 = pnand %p947_p0, %p941_p11 }
  0x42   :  { %951 = shalt.err (!%p948_p1)
}
  0x43   :  { %87 = dma.hbm_to_vmem [thread:$0]  %s1100_s6, 2304, %s82_s10, [#allocation12], %s989_s0, %s989_s0, %s990_s28  }
  0x44   :  { %972 = dma.done.wait [#allocation3], 64  }
  0x45   :  { %973 = vsyncadd [#allocation3], 4294967232 }
  0x46   :  { %974 = dma.done.wait [#allocation6], 832  }
  0x47   :  { %975 = vsyncadd [#allocation6], 4294966464 }
  0x48   :  { %976 = dma.done.wait [#allocation9], 640  }
  0x49   :  { %977 = vsyncadd [#allocation9], 4294966656 }
  0x4a   :  { %978 = dma.done.wait [#allocation12], 2304  }
  0x4b   :  { %979 = vsyncadd [#allocation12], 4294964992  ;;  %v992_v0 = vmov 0.0   ;;  %vm993_vm0 = vmmov 0   ;;  %v994_v1 = vmov 0   ;;  %vm139_vm1 = vcmask 130048  }
  0x4c   :  { %756 = vmatprep.subr.bf16.mxu1 %v992_v0  ;;  %758 = vmatprep.mubr.msk.bf16.mxu1 %vm993_vm0, %v992_v0  ;;  %v800_v2 = vld [vmem:[#allocation8 + $0x8] ss:$12 sps:$4 sm:$0xff]   ;;  %v118_v3 = vld [vmem:[#allocation5] sm:$0xf]  ;;  %v804_v6 = vld [vmem:[#allocation8 + $0x4] ss:$12 sps:$4 sm:$0xff]   ;;  %v343_v31 = vlaneseq }
  0x4d   :  { %175 = vmatprep.mubr.bf16.mxu0 %v994_v1  ;;  %757 = vmatpush3.bf16.msra.mxu1 %v800_v2  ;;  %v801_v4 = vld [vmem:[#allocation7 + $0x18] ss:$12 sps:$4 sm:$0xff]   ;;  %v803_v5 = vld [vmem:[#allocation7 + $0x1c] ss:$12 sps:$4 sm:$0xff]   ;;  %v806_v9 = vld [vmem:[#allocation7] ss:$12 sps:$4 sm:$0xff]  }
  0x4e   :  { %272 = vmatprep.subr.bf16.mxu1 %v803_v5  ;;  %v808_v7 = vld [vmem:[#allocation7 + $0x4] ss:$12 sps:$4 sm:$0xff]   ;;  %157 = vmatprep.subr.bf16.mxu0 %v804_v6  ;;  %v1063_v10 = vld [vmem:[#allocation2] sm:$0xf]  ;;  %v810_v11 = vld [vmem:[#allocation7 + $0x20] ss:$12 sps:$4 sm:$0xff]  }
  0x4f   :  { %v809_v8 = vld [vmem:[#allocation8] ss:$12 sps:$4 sm:$0xff]   ;;  %vm256_vm2 = vcmask 261120   ;;  %v814_v14 = vld [vmem:[#allocation11 + $0x70] sm:$0xff]   ;;  %v816_v17 = vld [vmem:[#allocation11 + $0x68] sm:$0xff]   ;;  %v344_v32 = vshrl.u32 %v343_v31, 7 }
  0x50   :  { %759 = vmatmul.mubr.msk.bf16.vlgmr.msra.gmra.mxu1 %vm139_vm1, %v118_v3  ;;  %158 = vmatpush1.bf16.msra.mxu0 %v809_v8  ;;  %v812_v12 = vld [vmem:[#allocation11 + $0x78] sm:$0xff]   ;;  %v815_v16 = vld [vmem:[#allocation11 + $0x30] sm:$0xff]   ;;  %v817_v18 = vld [vmem:[#allocation11 + $0x28] sm:$0xff]   ;;  %s995_s14 = smov [#allocation13]  }
  0x51   :  { %273 = vmatpush1.bf16.msra.mxu1 %v801_v4  ;;  %292 = vmatprep.mubr.bf16.mxu1 %v994_v1  ;;  %v813_v13 = vld [vmem:[#allocation11 + $0x38] sm:$0xff]   ;;  %v818_v19 = vld [vmem:[#allocation11 + $0x60] sm:$0xff]   ;;  %v822_v23 = vld [vmem:[#allocation11 + $0x50] sm:$0xff]   ;;  %v345_v35 = vsub.s32 0, %v344_v32  ;;  %v349_v39 = vsub.s32 1, %v344_v32  ;;  %v353_v51 = vsub.s32 2, %v344_v32 }
  0x52   :  { %274 = vmatprep.subr.bf16.mxu1 %v808_v7  ;;  %728 = vmatprep.subr.bf16.mxu0 %v812_v12  ;;  %v811_v15 = vld [vmem:[#allocation7 + $0x8] ss:$12 sps:$4 sm:$0xff]   ;;  %v819_v20 = vld [vmem:[#allocation11 + $0x20] sm:$0xff]   ;;  %v824_v25 = vld [vmem:[#allocation11 + $0x48] sm:$0xff]   ;;  %s675_s15 = sshll.u32 %s995_s14, 4  ;;  %s676_s15 = int_to_ptr.vmem [resolvable:$true] %s675_s15 }
  0x53   :  { %690 = vmatmul.mubr.msk.bf16.vlgmr.msra.gmra.mxu0 %vm139_vm1, %v118_v3  ;;  %v820_v21 = vld [vmem:[#allocation11 + $0x58] sm:$0xff]   ;;  %v823_v24 = vld [vmem:[#allocation11 + $0x10] sm:$0xff]   ;;  %v825_v26 = vld [vmem:[#allocation11 + $0x8] sm:$0xff]   ;;  %s952_s16 = scalar_lea.vmem %s676_s15, 128  ;;  %p957_p3 = scmp.lt.s32.totalorder %s676_s15, %s676_s15 }
  0x54   :  { %729 = vmatpush3.bf16.msra.mxu0 %v813_v13  ;;  %v821_v22 = vld [vmem:[#allocation11 + $0x18] sm:$0xff]   ;;  %v826_v27 = vld [vmem:[#allocation11 + $0x40] sm:$0xff]   ;;  %v827_v28 = vld [vmem:[#allocation11 + $0x88] sm:$0xff]   ;;  %p953_p2 = scmp.ne.s32.totalorder %s676_s15, %s952_s16  ;;  %p958_p4 = scmp.lt.s32.totalorder %s952_s16, %s952_s16 }
  0x55   :  { %275 = vmatpush1.bf16.msra.mxu1 %v806_v9  ;;  %730 = vmatprep.subr.bf16.mxu0 %v814_v14  ;;  %v828_v29 = vld [vmem:[#allocation11] sm:$0xff]   ;;  %v830_v2 = vld [vmem:[#allocation10 + $0x8] sm:$0xff]   ;;  %v831_v5 = vld [vmem:[#allocation10] sm:$0xff]  }
  0x56   :  { %762 = vmatprep.subr.bf16.mxu1 %v992_v0  ;;  %v829_v30 = vld [vmem:[#allocation11 + $0x80] sm:$0xff]   ;;  %p959_p5 = por %p958_p4, %p957_p3 }
  0x57   :  { %v341_v37 = vld [vmem:[%s1098_s4] sm:$0x7] }
  0x58   :  { %698 = vmatmul.mubr.msk.bf16.vlgmr.msra.gmra.mxu1 %vm256_vm2, %v1063_v10  ;;  %731 = vmatpush3.bf16.msra.mxu0 %v815_v16  ;;  %v346_v41 = vrot.slane %v341_v37, %v345_v35  ;;  %v350_v45 = vrot.slane %v341_v37, %v349_v39  ;;  %v354_v57 = vrot.slane %v341_v37, %v353_v51  ;;  %p960_p6 = pnand %p959_p5, %p953_p2 }
  0x59   :  { %763 = vmatpush3.bf16.msra.mxu1 %v810_v11  ;;  %766 = vmatprep.mubr.msk.bf16.mxu1 %vm993_vm0, %v992_v0 }
  0x5a   :  { %764 = vmatprep.subr.bf16.mxu1 %v992_v0  ;;  %732 = vmatprep.subr.bf16.mxu0 %v816_v17 }
  0x5c   :  { %733 = vmatpush3.bf16.msra.mxu0 %v817_v18  ;;  %v722_v18 = vld [vmem:[%s1101_s7] ss:$0 sm:$0xff] }
  0x5d   :  { %765 = vmatpush3.bf16.msra.mxu1 %v811_v15  ;;  %734 = vmatprep.subr.bf16.mxu0 %v818_v19 }
  0x5e   :  { %770 = vmatprep.subr.bf16.mxu1 %v992_v0 }
  0x60   :  { %767 = vmatmul.mubr.msk.bf16.vlgmr.msra.gmra.mxu1 %vm256_vm2, %v1063_v10  ;;  %735 = vmatpush3.bf16.msra.mxu0 %v819_v20 }
  0x61   :  { %774 = vmatprep.mubr.msk.bf16.mxu1 %vm993_vm0, %v992_v0  ;;  %736 = vmatprep.subr.bf16.mxu0 %v820_v21 }
  0x62   :  { %771 = vmatpush3.bf16.msra.mxu1 %v827_v28 }
  0x63   :  { %772 = vmatprep.subr.bf16.mxu1 %v992_v0 }
  0x64   :  { %737 = vmatpush3.bf16.msra.mxu0 %v821_v22 }
  0x65   :  { %738 = vmatprep.subr.bf16.mxu0 %v822_v23 }
  0x66   :  { %773 = vmatpush3.bf16.msra.mxu1 %v829_v30 }
  0x67   :  { %778 = vmatprep.subr.bf16.mxu1 %v992_v0 }
  0x68   :  { %739 = vmatpush3.bf16.msra.mxu0 %v823_v24 }
  0x69   :  { %740 = vmatprep.subr.bf16.mxu0 %v824_v25 }
  0x6c   :  { %741 = vmatpush3.bf16.msra.mxu0 %v825_v26 }
  0x6d   :  { %742 = vmatprep.subr.bf16.mxu0 %v826_v27 }
  0x70   :  { %743 = vmatpush3.bf16.msra.mxu0 %v828_v29 }
 0x110   :  { %v218_v33 = vpop.f32.mrf.mxu1 }
 0x112   :  { %v760_v34 = vpop.f32.mrf.mxu1 }
 0x113   :  { %v177_v38 = vpop.f32.mrf.mxu0 }
 0x114   :  { %v221_v36 = vpop.f32.mrf.mxu1 }
 0x115   :  { %v179_v42 = vpop.f32.mrf.mxu0 }
 0x116   :  { %v761_v40 = vpop.f32.mrf.mxu1 }
 0x117   :  { %v181_v46 = vpop.f32.mrf.mxu0 }
 0x118   :  { %v294_v43 = vpop.f32.mrf.mxu1 }
 0x119   :  { %v295_v44 = vadd.f32 %v294_v43, %v177_v38  ;;  %v182_v50 = vpop.f32.mrf.mxu0 }
 0x11a   :  { %v296_v47 = vpop.f32.mrf.mxu1 }
 0x11b   :  { %v358_v48 = vadd.f32 %v346_v41, %v295_v44  ;;  %v297_v49 = vadd.f32 %v296_v47, %v179_v42 }
 0x11c   :  { %v298_v52 = vpop.f32.mrf.mxu1 }
 0x11d   :  { %v359_v53 = vadd.f32 %v350_v45, %v297_v49  ;;  %v368_v54 = vmax.f32 %v358_v48, 0.0 }
 0x11e   :  { %v299_v55 = vpop.f32.mrf.mxu1 }
 0x11f   :  { %v369_v56 = vmax.f32 %v359_v53, 0.0  ;;  %v374_v61 = vpack.c.bf16 %v368_v54, %v368_v54 }
 0x120   :  { %v335_v58 = vpop.f32.mrf.mxu1 }
 0x121   :  { %v375_v59 = vpack.c.bf16 %v369_v56, %v369_v56  ;;  %v336_v60 = vadd.f32 %v335_v58, %v218_v33 }
 0x122   :  { %v768_v62 = vpop.f32.mrf.mxu1 }
 0x123   :  { %v360_v63 = vadd.f32 %v354_v57, %v336_v60  ;;  %560 = vmatprep.mubr.bf16.mxu0 %v375_v59 }
 0x124   :  { %v338_v1 = vpop.f32.mrf.mxu1  ;;  %561 = vmatmul.mubr.bf16.vlgmr.msra.gmra.mxu0 %v374_v61 }
 0x125   :  { %v376_v3 = vpack.c.bf16 %v360_v63, %v360_v63 }
 0x126   :  { %v769_v4 = vpop.f32.mrf.mxu1 }
 0x127   :  { %775 = vmatmul.mubr.msk.bf16.vlgmr.msra.gmra.mxu1 %vm256_vm2, %v376_v3 }
 0x128   :  { %779 = vmatpush3.bf16.msra.mxu1 %v830_v2  ;;  %782 = vmatprep.mubr.msk.bf16.mxu1 %vm993_vm0, %v992_v0 }
 0x129   :  { %780 = vmatprep.subr.bf16.mxu1 %v992_v0 }
 0x12c   :  { %781 = vmatpush3.bf16.msra.mxu1 %v831_v5 }
 0x12f   :  { %783 = vmatmul.mubr.msk.bf16.vlgmr.msra.gmra.mxu1 %vm256_vm2, %v1063_v10 }
 0x1e4   :  { %v744_v6 = vpop.f32.mrf.mxu0 }
 0x1e6   :  { %v745_v7 = vpop.f32.mrf.mxu0 }
 0x1e7   :  { %v602_v8 = vpop.f32.mrf.mxu1  ;;  %v746_v12 = vadd.f32 %v745_v7, %v744_v6 }
 0x1e8   :  { %v747_v9 = vpop.f32.mrf.mxu0 }
 0x1e9   :  { %v776_v11 = vpop.f32.mrf.mxu1  ;;  %v603_v16 = vadd.f32 %v746_v12, %v602_v8 }
 0x1ea   :  { %v748_v13 = vpop.f32.mrf.mxu0 }
 0x1eb   :  { %v605_v14 = vpop.f32.mrf.mxu1 }
 0x1ed   :  { %v777_v15 = vpop.f32.mrf.mxu1 }
 0x1ef   :  { %v654_v17 = vpop.f32.mrf.mxu1 }
 0x1f0   :  { %v655_v0 = vadd.f32 %v654_v17, %v603_v16 }
 0x1f1   :  { %v784_v19 = vpop.f32.mrf.mxu1 }
 0x1f2   :  { %v667_v10 = vadd.f32 %v722_v18, %v655_v0 }
 0x1f3   :  { %v657_v20 = vpop.f32.mrf.mxu1 }
 0x1f4   :  { %668 = vst [vmem:[#allocation13] sm:$0xff] %v667_v10 }
 0x1f5   :  { %v785_v21 = vpop.f32.mrf.mxu1 }
 0x1f6   :  { %963 = shalt.err (!%p960_p6)
}
 0x1f7   :  { %678 = dma.vmem_to_hbm [thread:$0]  %s676_s15, 128, %s1102_s8, [#allocation4]  }
 0x1f8   :  { %980 = dma.done.wait [#allocation4], 128  }
 0x1f9   :  { %981 = vsyncadd [#allocation4], 4294967168 }
 0x1fa   :  { %682 = vsyncpa [#allocation3], 1 }
 0x1fb   :  { %683 = vsyncpa [#allocation6], 1 }
 0x1fc   :  { %684 = vsyncpa [#allocation9], 1 }
 0x1fd   :  { %685 = vsyncpa [#allocation12], 1 }
 0x1fe   :  { %686 = vsyncpa [#allocation4], 1 }

</bundles_post_ra>
